<compile_context>
chip_gen: v7x
topology: tpu7x:2x2x1
jax: 0.10.0
libtpu: 0.0.40
codegen_flags: <defaults>
</compile_context>

<pallas_src>
import functools

import numpy as np
import jax
import jax.numpy as jnp
from jax.experimental import pallas as pl
from jax.experimental.pallas import tpu as pltpu


_SENTINEL = np.int32(np.iinfo(np.int32).max).item()  # 2**31 - 1
_LANES = 128


@functools.lru_cache(maxsize=1)
def _tensorcores_per_chip():
    """v7x exposes 2 independent TensorCores per chip; v5e/v6e are single-TC."""
    try:
        d = jax.devices()[0]
        if d.platform != "tpu":
            return 1
        kind = (getattr(d, "device_kind", "") or "").lower()
        return 2 if "v7" in kind else 1
    except Exception:
        return 1


def _voxelize_key_kernel(pcb_ref, key_ref, cnt_ref, *, lo, hi, sshape):
    """Elementwise hot path: range mask + sparse quantization + row-key encoding.

    pcb_ref : (4, TM, 128) f32 block; rows are [x, y, z, batch_as_f32].
    key_ref : (TM, 128) i32 block; lexicographic key of [b, ix, iy, iz];
              out-of-range (filtered) and padded points get INT32_MAX.
    cnt_ref : (8, 128) i32 block; row 0 holds per-lane valid counts for this
              block (other rows zero) -- summed by XLA outside the kernel.
    """
    x = pcb_ref[0]                       # (TM, 128) f32
    y = pcb_ref[1]
    z = pcb_ref[2]
    b = pcb_ref[3].astype(jnp.int32)     # exact for batch indices < 2**24

    eps = 1e-4
    mask = ((x > (lo[0] + eps)) & (x < (hi[0] - eps))
            & (y > (lo[1] + eps)) & (y < (hi[1] - eps))
            & (z > (lo[2] + eps)) & (z < (hi[2] - eps)))

    sx, sy, sz = sshape
    # idx = spatial_shape * (pc - lo) / (hi - lo), truncated toward zero (.long()).
    # The divide is kept in the same op order as torch for bit-exact quantization;
    # on v5e/v6e it hides fully under the HBM stream (kernel is byte-bound).
    ix = (sx * (x - lo[0]) / (hi[0] - lo[0])).astype(jnp.int32)
    iy = (sy * (y - lo[1]) / (hi[1] - lo[1])).astype(jnp.int32)
    iz = (sz * (z - lo[2]) / (hi[2] - lo[2])).astype(jnp.int32)

    # Lexicographic (mixed-radix) encoding of [b, ix, iy, iz]; valid points have
    # 0 <= idx < spatial_shape, so key order == row lexicographic order.
    key = ((b * sx + ix) * sy + iy) * sz + iz
    key_ref[...] = jnp.where(mask, key, _SENTINEL)

    # Fused valid-point count: sublane reduce (XLU slot) into row 0 of the tile.
    partial = jnp.sum(mask.astype(jnp.int32), axis=0, keepdims=True)      # (1,128)
    row_sel = jax.lax.broadcasted_iota(jnp.int32, (8, _LANES), 0) == 0
    cnt_ref[...] = jnp.where(row_sel, partial, 0)


def _unique_from_keys(keys, num_valid, sx, sy, sz):
    """Emulate torch.unique(bxyz, return_inverse=True, dim=0) from encoded keys."""
    n = keys.shape[0]
    valid = keys != _SENTINEL

    order = jnp.argsort(keys, stable=True)   # valid keys ascending, sentinels last
    sk = keys[order]
    pos = jnp.arange(n, dtype=jnp.int32)
    is_new = jnp.concatenate([jnp.ones((1,), jnp.bool_), sk[1:] != sk[:-1]])
    is_new = is_new & (pos < num_valid)
    rank = (jnp.cumsum(is_new.astype(jnp.int32)) - 1).astype(jnp.int32)
    num_unique = jnp.sum(is_new.astype(jnp.int32))

    # Inverse index for every original position (garbage for invalid positions).
    inv_full = jnp.zeros((n,), jnp.int32).at[order].set(rank)

    # Unique keys in sorted order, padded with sentinel; out-of-bounds scatter
    # indices (== n) are dropped, so the sentinel tail never overwrites rank
    # num_unique - 1.
    unq_keys = jnp.full((n,), _SENTINEL, jnp.int32).at[
        jnp.where(pos < num_valid, rank, n)].set(sk)

    # Decode [b, ix, iy, iz] for the unique rows.
    iz = unq_keys % sz
    t = unq_keys // sz
    iy = t % sy
    t = t // sy
    ix = t % sx
    bb = t // sx
    unq = jnp.stack([bb, ix, iy, iz], axis=-1)   # (n, 4); rows >= num_unique garbage

    # Compact inverse indices back to original valid-point order (no host sync).
    dest = jnp.cumsum(valid.astype(jnp.int32)) - 1
    inv_compact = jnp.zeros((n,), jnp.int32).at[
        jnp.where(valid, dest, n)].set(inv_full)

    return unq, inv_compact, num_unique


@functools.partial(jax.jit, static_argnames=("lo", "hi", "sshape", "tm"))
def _voxelize_device(packed, *, lo, hi, sshape, tm):
    """packed: (4, n_rows, 128) f32.  Returns (unq_pad, inv_pad, num_valid, num_unique)."""
    n_rows = packed.shape[1]
    assert tm % 8 == 0 and n_rows % tm == 0, (tm, n_rows)   # exact grid coverage
    steps = n_rows // tm
    sx, sy, sz = sshape

    kernel = functools.partial(_voxelize_key_kernel, lo=lo, hi=hi, sshape=sshape)

    # Per-step footprint x2 (double buffering); default 32 MiB scoped VMEM is
    # plenty at tm<=2048, only raise the limit if the user pushes tm_max higher
    # (v7x has 64 MiB physical VMEM).
    block_bytes = (4 * tm * _LANES + tm * _LANES + 8 * _LANES) * 4
    params = {"dimension_semantics": ("parallel",)}
    if 2 * block_bytes > (24 << 20):
        params["vmem_limit_bytes"] = min(2 * block_bytes + (8 << 20), 64 << 20)

    key2, cnt = pl.pallas_call(
        kernel,
        out_shape=(jax.ShapeDtypeStruct((n_rows, _LANES), jnp.int32),
                   jax.ShapeDtypeStruct((steps * 8, _LANES), jnp.int32)),
        grid=(steps,),
        in_specs=[pl.BlockSpec((4, tm, _LANES), lambda i: (0, i, 0))],
        out_specs=(pl.BlockSpec((tm, _LANES), lambda i: (i, 0)),
                   pl.BlockSpec((8, _LANES), lambda i: (i, 0))),
        compiler_params=pltpu.CompilerParams(**params),
    )(packed)

    keys = key2.reshape(-1)
    num_valid = jnp.sum(cnt)                     # fused count, no 2nd pass over keys
    unq, inv, num_unique = _unique_from_keys(keys, num_valid, sx, sy, sz)
    return unq, inv, num_valid, num_unique


class Voxelization:
    def __init__(self, point_cloud_range, spatial_shape, tm_max=2048, max_batches=None):
        self.spatial_shape = tuple(int(s) for s in spatial_shape)
        self.lo = (float(point_cloud_range[0]), float(point_cloud_range[1]),
                   float(point_cloud_range[2]))
        self.hi = (float(point_cloud_range[3]), float(point_cloud_range[4]),
                   float(point_cloud_range[5]))
        # Force tm_max to a power of two so tiles are (8,128)-aligned and divide
        # the padded row count exactly (fixes the silent-trailing-rows hazard).
        tm_max = int(tm_max)
        self.tm_max = max(8, 1 << (tm_max.bit_length() - 1))
        # int32 key-overflow check moved to construction (removes the per-call
        # max(batch_idx) device sync).
        if max_batches is not None:
            sx, sy, sz = self.spatial_shape
            if int(max_batches) * sx * sy * sz >= 2 ** 31:
                raise ValueError(
                    "int32 voxel-key overflow: max_batches * prod(spatial_shape) "
                    "must be < 2**31 for the single-key unique path")
        # TODO(synk): for huge grids (batch * prod(spatial_shape) >= 2**31) switch
        # to a hi/lo two-key sort.

    def _select_tiling(self, n_points):
        num_tc = _tensorcores_per_chip()
        min_steps = 2 * num_tc              # >= 2 blocks per TensorCore to pipeline
        rows_needed = max(8, -(-int(n_points) // _LANES))
        tm = 8
        while tm * 2 <= self.tm_max and tm * min_steps < rows_needed:
            tm *= 2
        raw_steps = max(min_steps, -(-rows_needed // tm))
        # 1.25x step bucketing: bounds distinct compile shapes while keeping the
        # argsort length (n_pad) within ~25% of the true point count.
        steps = min_steps
        while steps < raw_steps:
            steps = max(steps + 1, int(steps * 1.25))
        if steps % num_tc:                  # keep v7x's two cores load-balanced
            steps += num_tc - steps % num_tc
        return tm, steps

    def __call__(self, pc, batch_idx):
        n = int(pc.shape[0])
        tm, steps = self._select_tiling(n)
        n_pad = tm * steps * _LANES

        # One packed layout pass, done OUTSIDE the main jit so the compiled
        # pallas+unique function is keyed only on the bucket (tm, steps), not N.
        # Padded lanes get an out-of-range value -> masked to sentinel in-kernel.
        pad_val = min(self.lo) - 1e3
        packed = jnp.concatenate(
            [jnp.asarray(pc)[:, :3].astype(jnp.float32).T,
             jnp.asarray(batch_idx).astype(jnp.float32)[None, :]], axis=0)   # (4, N)
        packed = jnp.pad(packed, ((0, 0), (0, n_pad - n)), constant_values=pad_val)
        packed = packed.reshape(4, n_pad // _LANES, _LANES)

        unq_pad, inv_pad, num_valid, num_unique = _voxelize_device(
            packed, lo=self.lo, hi=self.hi, sshape=self.spatial_shape, tm=tm)

        # Single host sync for both dynamic sizes (also drives the <10 fallback).
        nv, nu = (int(v) for v in jax.device_get((num_valid, num_unique)))

        if nv < 10:
            # TODO(synk): torch.rand_like fallback -- RNG is not bit-compatible
            # with torch; 10 points, so the unique runs on host numpy.
            rpc = np.asarray(jax.random.uniform(jax.random.PRNGKey(0), (10, 3),
                                                dtype=jnp.float32))
            lo = np.asarray(self.lo, np.float32)
            hi = np.asarray(self.hi, np.float32)
            ss = np.asarray(self.spatial_shape, np.float32)
            idx = (ss * (rpc - lo) / (hi - lo)).astype(np.int64)
            bxyz = np.concatenate([np.zeros((10, 1), np.int64), idx], axis=1)
            unq_np, inv_np = np.unique(bxyz, return_inverse=True, axis=0)
            return (jnp.asarray(unq_np, jnp.int32),
                    jnp.asarray(inv_np.reshape(-1), jnp.int32))

        return unq_pad[:nu], inv_pad[:nv]


if __name__ == "__main__":
    point_cloud_range = [-10.0, -10.0, -2.0, 10.0, 10.0, 2.0]
    spatial_shape = (16, 16, 8)
    vox = Voxelization(point_cloud_range, spatial_shape, max_batches=2)

    key = jax.random.PRNGKey(0)
    k1, k2, k3 = jax.random.split(key, 3)
    N = 200
    xy = jax.random.uniform(k1, (N, 2), minval=-12.0, maxval=12.0)
    zz = jax.random.uniform(k2, (N, 1), minval=-3.0, maxval=3.0)
    pc = jnp.concatenate([xy, zz], axis=1).astype(jnp.float32)
    batch_idx = jax.random.randint(k3, (N,), 0, 2).astype(jnp.int32)

    unq, unq_inv = vox(pc, batch_idx)
    jax.block_until_ready((unq, unq_inv))

    # Reference (numpy, float32 arithmetic to mirror the kernel's dtype).
    pcn = np.asarray(pc)
    bn = np.asarray(batch_idx).astype(np.int64)
    lo32 = np.asarray(point_cloud_range[:3], np.float32)
    hi32 = np.asarray(point_cloud_range[3:], np.float32)
    eps32 = np.float32(1e-4)
    m_ref = np.all((pcn > (lo32 + eps32)) & (pcn < (hi32 - eps32)), axis=1)
    fpc = pcn[m_ref]
    fb = bn[m_ref]
    ss32 = np.asarray(spatial_shape, np.float32)
    idx_ref = (ss32 * (fpc - lo32) / (hi32 - lo32)).astype(np.int64)
    bxyz_ref = np.concatenate([fb[:, None], idx_ref], axis=1)
    unq_ref, unq_inv_ref = np.unique(bxyz_ref, return_inverse=True, axis=0)

    assert np.array_equal(np.asarray(unq, np.int64), unq_ref), "unique rows mismatch"
    assert np.array_equal(np.asarray(unq_inv, np.int64), unq_inv_ref.reshape(-1)), \
        "inverse indices mismatch"
    # Structural sanity: reconstruction property of (unq, unq_inv).
    assert np.array_equal(np.asarray(unq)[np.asarray(unq_inv)], bxyz_ref)

    # Fallback (<10 valid points) smoke test: all points out of range.
    pc_far = jnp.full((5, 3), 100.0, jnp.float32)
    b_far = jnp.zeros((5,), jnp.int32)
    unq_f, inv_f = vox(pc_far, b_far)
    jax.block_until_ready((unq_f, inv_f))
    assert unq_f.shape[1] == 4 and inv_f.shape[0] == 10 and 1 <= unq_f.shape[0] <= 10

    print("KERNEL_OK")
</pallas_src>

<mosaic_0001>
module attributes {stable_mosaic.version = 11 : i64} {
  func.func private @main(%arg0: i32) attributes {dimension_semantics = [#tpu.dimension_semantics<core_parallel>], iteration_bounds = array<i64: 2>, tpu.core_type = #tpu.core_type<sc_scalar_subcore>, window_params = []} {
    return
  }
}

module attributes {stable_mosaic.version = 11 : i64} {
  func.func private @main(%arg0: i32) attributes {dimension_semantics = [#tpu.dimension_semantics<core_parallel>], iteration_bounds = array<i64: 2>, tpu.core_type = #tpu.core_type<sc_scalar_subcore>, window_params = []} {
    return
  }
}

module attributes {stable_mosaic.version = 11 : i64} {
  func.func @_voxelize_key_kernel(%arg0: i32, %arg1: memref<4x8x128xf32, #tpu.memory_space<vmem>>, %arg2: memref<8x128xi32, #tpu.memory_space<vmem>>, %arg3: memref<8x128xi32, #tpu.memory_space<vmem>>) attributes {dimension_semantics = [#tpu.dimension_semantics<parallel>], iteration_bounds = array<i64: 2>, scalar_prefetch = 0 : i64, scratch_operands = 0 : i64, tpu.core_type = #tpu.core_type<tc>, window_params = [{transform_indices = @transform_0, window_bounds = array<i64: 4, 8, 128>}, {transform_indices = @transform_1, window_bounds = array<i64: 8, 128>}, {transform_indices = @transform_2, window_bounds = array<i64: 8, 128>}]} {
    %c0 = arith.constant 0 : index
    %c0_0 = arith.constant 0 : index
    %c0_1 = arith.constant 0 : index
    %0 = vector.load %arg1[%c0, %c0_0, %c0_1] : memref<4x8x128xf32, #tpu.memory_space<vmem>>, vector<1x8x128xf32>
    %1 = vector.shape_cast %0 : vector<1x8x128xf32> to vector<8x128xf32>
    %c1 = arith.constant 1 : index
    %c0_2 = arith.constant 0 : index
    %c0_3 = arith.constant 0 : index
    %2 = vector.load %arg1[%c1, %c0_2, %c0_3] : memref<4x8x128xf32, #tpu.memory_space<vmem>>, vector<1x8x128xf32>
    %3 = vector.shape_cast %2 : vector<1x8x128xf32> to vector<8x128xf32>
    %c2 = arith.constant 2 : index
    %c0_4 = arith.constant 0 : index
    %c0_5 = arith.constant 0 : index
    %4 = vector.load %arg1[%c2, %c0_4, %c0_5] : memref<4x8x128xf32, #tpu.memory_space<vmem>>, vector<1x8x128xf32>
    %5 = vector.shape_cast %4 : vector<1x8x128xf32> to vector<8x128xf32>
    %c3 = arith.constant 3 : index
    %c0_6 = arith.constant 0 : index
    %c0_7 = arith.constant 0 : index
    %6 = vector.load %arg1[%c3, %c0_6, %c0_7] : memref<4x8x128xf32, #tpu.memory_space<vmem>>, vector<1x8x128xf32>
    %7 = vector.shape_cast %6 : vector<1x8x128xf32> to vector<8x128xf32>
    %8 = arith.fptosi %7 : vector<8x128xf32> to vector<8x128xi32>
    %cst = arith.constant -9.99989986 : f32
    %9 = vector.broadcast %cst : f32 to vector<8x128xf32>
    %10 = arith.cmpf ogt, %1, %9 : vector<8x128xf32>
    %cst_8 = arith.constant 9.99989986 : f32
    %11 = vector.broadcast %cst_8 : f32 to vector<8x128xf32>
    %12 = arith.cmpf olt, %1, %11 : vector<8x128xf32>
    %13 = arith.andi %10, %12 : vector<8x128xi1>
    %cst_9 = arith.constant -9.99989986 : f32
    %14 = vector.broadcast %cst_9 : f32 to vector<8x128xf32>
    %15 = arith.cmpf ogt, %3, %14 : vector<8x128xf32>
    %16 = arith.andi %13, %15 : vector<8x128xi1>
    %cst_10 = arith.constant 9.99989986 : f32
    %17 = vector.broadcast %cst_10 : f32 to vector<8x128xf32>
    %18 = arith.cmpf olt, %3, %17 : vector<8x128xf32>
    %19 = arith.andi %16, %18 : vector<8x128xi1>
    %cst_11 = arith.constant -1.999900e+00 : f32
    %20 = vector.broadcast %cst_11 : f32 to vector<8x128xf32>
    %21 = arith.cmpf ogt, %5, %20 : vector<8x128xf32>
    %22 = arith.andi %19, %21 : vector<8x128xi1>
    %cst_12 = arith.constant 1.999900e+00 : f32
    %23 = vector.broadcast %cst_12 : f32 to vector<8x128xf32>
    %24 = arith.cmpf olt, %5, %23 : vector<8x128xf32>
    %25 = arith.andi %22, %24 : vector<8x128xi1>
    %cst_13 = arith.constant -1.000000e+01 : f32
    %26 = vector.broadcast %cst_13 : f32 to vector<8x128xf32>
    %27 = arith.subf %1, %26 : vector<8x128xf32>
    %cst_14 = arith.constant 1.600000e+01 : f32
    %28 = vector.broadcast %cst_14 : f32 to vector<8x128xf32>
    %29 = arith.mulf %28, %27 : vector<8x128xf32>
    %cst_15 = arith.constant 2.000000e+01 : f32
    %30 = vector.broadcast %cst_15 : f32 to vector<8x128xf32>
    %31 = arith.divf %29, %30 : vector<8x128xf32>
    %32 = arith.fptosi %31 : vector<8x128xf32> to vector<8x128xi32>
    %cst_16 = arith.constant -1.000000e+01 : f32
    %33 = vector.broadcast %cst_16 : f32 to vector<8x128xf32>
    %34 = arith.subf %3, %33 : vector<8x128xf32>
    %cst_17 = arith.constant 1.600000e+01 : f32
    %35 = vector.broadcast %cst_17 : f32 to vector<8x128xf32>
    %36 = arith.mulf %35, %34 : vector<8x128xf32>
    %cst_18 = arith.constant 2.000000e+01 : f32
    %37 = vector.broadcast %cst_18 : f32 to vector<8x128xf32>
    %38 = arith.divf %36, %37 : vector<8x128xf32>
    %39 = arith.fptosi %38 : vector<8x128xf32> to vector<8x128xi32>
    %cst_19 = arith.constant -2.000000e+00 : f32
    %40 = vector.broadcast %cst_19 : f32 to vector<8x128xf32>
    %41 = arith.subf %5, %40 : vector<8x128xf32>
    %cst_20 = arith.constant 8.000000e+00 : f32
    %42 = vector.broadcast %cst_20 : f32 to vector<8x128xf32>
    %43 = arith.mulf %42, %41 : vector<8x128xf32>
    %cst_21 = arith.constant 4.000000e+00 : f32
    %44 = vector.broadcast %cst_21 : f32 to vector<8x128xf32>
    %45 = arith.divf %43, %44 : vector<8x128xf32>
    %46 = arith.fptosi %45 : vector<8x128xf32> to vector<8x128xi32>
    %c16_i32 = arith.constant 16 : i32
    %47 = vector.broadcast %c16_i32 : i32 to vector<8x128xi32>
    %48 = arith.muli %8, %47 : vector<8x128xi32>
    %49 = arith.addi %48, %32 : vector<8x128xi32>
    %c16_i32_22 = arith.constant 16 : i32
    %50 = vector.broadcast %c16_i32_22 : i32 to vector<8x128xi32>
    %51 = arith.muli %49, %50 : vector<8x128xi32>
    %52 = arith.addi %51, %39 : vector<8x128xi32>
    %c8_i32 = arith.constant 8 : i32
    %53 = vector.broadcast %c8_i32 : i32 to vector<8x128xi32>
    %54 = arith.muli %52, %53 : vector<8x128xi32>
    %55 = arith.addi %54, %46 : vector<8x128xi32>
    %c2147483647_i32 = arith.constant 2147483647 : i32
    %56 = vector.broadcast %c2147483647_i32 : i32 to vector<8x128xi32>
    %57 = arith.select %25, %55, %56 : vector<8x128xi1>, vector<8x128xi32>
    %c0_23 = arith.constant 0 : index
    %c0_24 = arith.constant 0 : index
    %58 = vector.load %arg2[%c0_23, %c0_24] : memref<8x128xi32, #tpu.memory_space<vmem>>, vector<8x128xi32>
    tpu.vector_store %arg2[%c0_23, %c0_24], %57 {strides = array<i32>} : memref<8x128xi32, #tpu.memory_space<vmem>>, vector<8x128xi32>,
    %59 = arith.extui %25 : vector<8x128xi1> to vector<8x128xi32>
    %cst_25 = arith.constant dense<0> : vector<128xi32>
    %60 = vector.multi_reduction <add>, %59, %cst_25 [0] : vector<8x128xi32> to vector<128xi32>
    %61 = vector.shape_cast %60 : vector<128xi32> to vector<1x128xi32>
    %62 = tpu.iota {dimensions = array<i32: 0>} : vector<8x128xi32>
    %c0_i32 = arith.constant 0 : i32
    %63 = vector.broadcast %c0_i32 : i32 to vector<8x128xi32>
    %64 = arith.cmpi eq, %62, %63 : vector<8x128xi32>
    %c0_i32_26 = arith.constant 0 : i32
    %65 = vector.shape_cast %61 : vector<1x128xi32> to vector<1x128xi32>
    %66 = vector.broadcast %65 : vector<1x128xi32> to vector<8x128xi32>
    %67 = vector.broadcast %c0_i32_26 : i32 to vector<8x128xi32>
    %68 = arith.select %64, %66, %67 : vector<8x128xi1>, vector<8x128xi32>
    %c0_27 = arith.constant 0 : index
    %c0_28 = arith.constant 0 : index
    %69 = vector.load %arg3[%c0_27, %c0_28] : memref<8x128xi32, #tpu.memory_space<vmem>>, vector<8x128xi32>
    tpu.vector_store %arg3[%c0_27, %c0_28], %68 {strides = array<i32>} : memref<8x128xi32, #tpu.memory_space<vmem>>, vector<8x128xi32>,
    return
  }
  func.func @transform_0(%arg0: i32) -> (i32, i32, i32) {
    %c0_i32 = arith.constant 0 : i32
    %c0_i32_0 = arith.constant 0 : i32
    %c0_i32_1 = arith.constant 0 : i32
    return %c0_i32, %arg0, %c0_i32_0 : i32, i32, i32
  }
  func.func @transform_1(%arg0: i32) -> (i32, i32) {
    %c0_i32 = arith.constant 0 : i32
    %c0_i32_0 = arith.constant 0 : i32
    return %arg0, %c0_i32 : i32, i32
  }
  func.func @transform_2(%arg0: i32) -> (i32, i32) {
    %c0_i32 = arith.constant 0 : i32
    %c0_i32_0 = arith.constant 0 : i32
    return %arg0, %c0_i32 : i32, i32
  }
}

</mosaic_0001>

<bundles_post_ra>
// kernel: _voxelize_device.1
= control target key start
LH: loop header
LB: loop body
LE: loop exit
PB: predicated region body
PF: predicated region fallthrough
CT: control target
= control target key end

     0   :  { %8 = vsyncpa [#allocation3], 0  ;;  %s592_s0 = inlined_call_operand.hbm [shape: f32[4,16,128], index: 0, kind: input, shape index: {}]   ;;  %s593_s1 = inlined_call_operand.vmem [shape: s32[16,128], index: 1, kind: output, shape index: {0}]   ;;  %s594_s2 = inlined_call_operand.vmem [shape: s32[16,128], index: 2, kind: output, shape index: {1}]  }
   0x1   :  { %10 = vsyncpa [#allocation3 + $0x1], 0  ;;  %s475_s9 = smov 0   ;;  %s477_s10 = smov 0  }
   0x2   :  { %s479_s11 = smov 0   ;;  %s481_s12 = smov 0  }
   0x3 LB: > { %s494_s13 = sadd.s32 4294967295, %s453_s12   ;;  %s497_s14 = sadd.s32 1, %s453_s12   ;;  %s453_s12 = sphi %s481_s12, %s602_s12   ;;  %s449_s11 = sphi %s479_s11, %s601_s11   ;;  %s445_s10 = sphi %s477_s10, %s600_s10   ;;  %s441_s9 = sphi %s475_s9, %s599_s9  }
   0x4   : > { %s20_s15 = ssub.s32 %s453_s12, %s497_s14  ;;  %s23_s16 = sadd.s32 1, %s449_s11 }
   0x5   : > { %p21_p0 = scmp.eq.s32.totalorder %s20_s15, 0  ;;  %p30_p1 = scmp.ne.s32.totalorder %s449_s11, %s445_s10 }
   0x6   : > { %p31_p2 = scmp.eq.s32.totalorder %s453_s12, 0  ;;  %p36_p3 = scmp.ne.s32.totalorder %s445_s10, %s441_s9 }
   0x7   : > { %s507_s17 = scalar_select %p21_p0, %s449_s11, %s23_s16  }
   0x8   : > { %p32_p4 = por %p31_p2, %p30_p1  ;;  %p37_p5 = scmp.eq.s32.totalorder %s494_s13, 0 }
   0x9   : > { %p352_p6 = scmp.lt.s32.totalorder %s453_s12, 2  ;;  %s112_s19 = sand.u32 1, %s449_s11  }
   0xa   : > { %p511_p7 = por %p37_p5, %p36_p3  ;;  %s324_s20 = sshll.u32 %s112_s19, 5 }
   0xb   : > { %s325_s21 = sshll.u32 %s453_s12, 7  ;;  %s116_s25 = scalar_lea.vmem [#allocation2], %s324_s20 }
   0xc   : > { %s520_s24 = scalar_lea.hbm %s592_s0, %s325_s21  ;;  %s122_s26 = sshll.u32 %s116_s25, 4  ;;  %s522_s26 = int_to_ptr.vmem [resolvable:$true] %s122_s26 }
   0xd   : > { %p524_p8 = pnand %p352_p6, %p32_p4  ;;  %s528_s28 = scalar_lea.sflag [#allocation3], %s112_s19 }
   0xe   : > { %s389_s29 = scalar_lea.hbm %s520_s24, 512  ;;  %s394_s4 = scalar_lea.hbm %s592_s0, 1024 }
   0xf   : > { %p390_p9 = scmp.ne.s32.totalorder %s520_s24, %s389_s29  ;;  %p391_p10 = pneg %p524_p8 }
  0x10   : > { %p395_p13 = scmp.lt.u32.totalorder %s520_s24, %s592_s0  ;;  %p396_p0 = scmp.lt.u32.totalorder %s394_s4, %s389_s29 }
  0x11   : > { %p392_p11 = pnand %p391_p10, %p390_p9  ;;  %p398_p2 = scmp.lt.u32.totalorder %s389_s29, %s520_s24 }
  0x12   : > { %p397_p1 = por %p396_p0, %p395_p13 }
  0x13   : > { %p393_p12 = pneg %p392_p11 }
  0x14   : > { %p399_p3 = por %p398_p2, %p397_p1 }
  0x16   : > { %p400_p4 = pnand %p399_p3, %p393_p12 }
  0x18   : > { %403 = shalt.err (!%p400_p4)
}
  0x19   : > { %s404_s7 = scalar_lea.vmem %s522_s26, 512  ;;  %s455_s8 = smov [#allocation2]  }
  0x1a   : > { %p405_p5 = scmp.ne.s32.totalorder %s522_s26, %s404_s7  ;;  %s409_s9 = sshll.u32 %s455_s8, 4  ;;  %s410_s9 = int_to_ptr.vmem [resolvable:$false] %s409_s9 }
  0x1b   : > { %s411_s15 = scalar_lea.vmem %s410_s9, 1024  ;;  %p412_p11 = scmp.lt.s32.totalorder %s522_s26, %s410_s9 }
  0x1c   : > { %p407_p6 = pnand %p405_p5, %p391_p10  ;;  %p413_p13 = scmp.lt.s32.totalorder %s411_s15, %s404_s7 }
  0x1e   : > { %p408_p9 = pneg %p407_p6  ;;  %p414_p0 = por %p413_p13, %p412_p11 }
  0x20   : > { %p415_p1 = pnand %p414_p0, %p408_p9 }
  0x22   : > { %418 = shalt.err (!%p415_p1)
}
  0x23   : > { %s456_s16 = smov 256   ;;  %s457_s19 = smov 128  }
  0x24   : > { %s458_s20 = smov 8   ;;  %p326_p10 = scmp.ge.s32.totalorder %s453_s12, 1 }
  0x25   : > { %351 = dma.hbm_to_vmem [thread:$0]  (!%p524_p8), %s520_s24, 512, %s522_s26, %s528_s28, %s456_s16, %s457_s19, %s458_s20  }
  0x26   : > { %p130_p12 = scmp.lt.s32.totalorder %s453_s12, 3 }
  0x28   : > { %p131_p2 = pnand %p326_p10, %p130_p12 }
  0x29   : > { %s136_s21 = sand.u32 (!%p131_p2), 1, %s445_s10  }
  0x2a   : > { %134 = sbr.rel (%p131_p2) target bundleno = 74 (0x4a), region = 24  ;;  %s327_s22 = sshll.u32 (!%p131_p2), %s136_s21, 5 }
  0x2b   : > { %s137_s23 = scalar_lea.sflag (!%p131_p2), [#allocation3], %s136_s21  ;;  %s140_s25 = scalar_lea.vmem (!%p131_p2), [#allocation2], %s327_s22 }
  0x31   : > { %436 = dma.done.wait (%p511_p7), %s137_s23, 512  }
  0x32   : > { %438 = vsyncadd (%p511_p7), %s137_s23, 4294966784  ;;  %v172_v0 = vld [vmem:[%s140_s25] sm:$0xff]  ;;  %v330_v1 = vld [vmem:[%s140_s25 + $0x8] sm:$0xff]  ;;  %p164_p7 = scmp.lt.s32.totalorder %s494_s13, 1  ;;  %v459_v18 = vmov 0   ;;  %v220_v23 = vlaneseq }
  0x33   : > { %v331_v2 = vld [vmem:[%s140_s25 + $0x10] sm:$0xff]  ;;  %v332_v3 = vld [vmem:[%s140_s25 + $0x18] sm:$0xff]  ;;  %vm180_vm0 = vcmp.gt.f32.partialorder %v172_v0, -9.9999  ;;  %vm181_vm1 = vcmp.lt.f32.partialorder %v172_v0, 9.9999 }
  0x34   : > { %v333_v4 = vadd.f32 10.0, %v172_v0  ;;  %v338_v5 = vtrunc.f32 %v332_v3  ;;  %vm182_vm2 = vmand %vm180_vm0, %vm181_vm1  ;;  %vm183_vm3 = vcmp.gt.f32.partialorder %v330_v1, -9.9999  ;;  %vm185_vm4 = vcmp.lt.f32.partialorder %v330_v1, 9.9999  ;;  %s604_s13 = smov (!%p164_p7, %s494_s13), 1 }
  0x35   : > { %vm187_vm5 = vcmp.gt.f32.partialorder %v331_v2, -1.9999  ;;  %vm184_vm6 = vmand %vm182_vm2, %vm183_vm3  ;;  %vm189_vm7 = vcmp.lt.f32.partialorder %v331_v2, 1.9999  ;;  %v334_v7 = vadd.f32 10.0, %v330_v1  ;;  %v335_v8 = vadd.f32 2.0, %v331_v2 }
  0x36   : > { %v192_v6 = vmul.f32 16.0, %v333_v4  ;;  %v339_v9 = vcvt.f32.s32 %v338_v5  ;;  %vm186_vm8 = vmand %vm184_vm6, %vm185_vm4  ;;  %v221_v30 = vshrl.u32 %v220_v23, 7  ;;  %s328_s12 = sshll.u32 %s604_s13, 3 }
  0x37   : > { %vm188_vm9 = vmand %vm186_vm8, %vm187_vm5  ;;  %v197_v11 = vmul.f32 16.0, %v334_v7  ;;  %v201_v12 = vmul.f32 8.0, %v335_v8  ;;  %s171_s26 = scalar_lea.vmem %s594_s2, %s328_s12  ;;  %s167_s29 = scalar_lea.vmem %s593_s1, %s328_s12 }
  0x38   : > { %v194_v10 = vmul.f32 0.05, %v192_v6  ;;  %vm563_vm10 = vmand %vm188_vm9, %vm189_vm7  ;;  %v205_v14 = vmul.u32 16, %v339_v9  ;;  %vm222_vm11 = vcmp.eq.s32.totalorder %v221_v30, 0 }
  0x39   : > { %v198_v16 = vmul.f32 0.05, %v197_v11  ;;  %v203_v17 = vmul.f32 0.25, %v201_v12  ;;  %v213_v19 = vsel %vm563_vm10, 1, %v459_v18 }
  0x3a   : > { %v340_v15 = vtrunc.f32 %v194_v10  ;;  %v214_v20 = vrot.slane %v213_v19, 4 }
  0x3b   : > { %v342_v22 = vtrunc.f32 %v198_v16  ;;  %v344_v26 = vtrunc.f32 %v203_v17 }
  0x3c   : > { %v341_v21 = vcvt.f32.s32 %v340_v15  ;;  %v215_v24 = vadd.s32 %v214_v20, %v213_v19 }
  0x3d   : > { %v343_v25 = vcvt.f32.s32 %v342_v22  ;;  %v345_v32 = vcvt.f32.s32 %v344_v26 }
  0x3e   : > { %v206_v27 = vadd.s32 %v341_v21, %v205_v14  ;;  %v216_v28 = vrot.slane %v215_v24, 2 }
  0x40   : > { %v207_v29 = vmul.u32 16, %v206_v27  ;;  %v217_v31 = vadd.s32 %v216_v28, %v215_v24 }
  0x42   : > { %v208_v33 = vadd.s32 %v343_v25, %v207_v29  ;;  %v218_v34 = vrot.slane %v217_v31, 1 }
  0x44   : > { %v209_v35 = vmul.u32 8, %v208_v33  ;;  %v219_v36 = vadd.s32 %v218_v34, %v217_v31 }
  0x46   : > { %v210_v37 = vadd.s32 %v345_v32, %v209_v35  ;;  %v223_v38 = vsel %vm222_vm11, %v219_v36, 0 }
  0x47   : > { %224 = vst [vmem:[%s171_s26] sm:$0xff] %v223_v38 }
  0x48   : > { %v211_v39 = vsel %vm563_vm10, %v210_v37, 2147483647 }
  0x49   : > { %212 = vst [vmem:[%s167_s29] sm:$0xff] %v211_v39 }
  0x4a PF: > { %p13_p8 = scmp.ge.s32.totalorder %s497_s14, 4   ;;  %s599_s9 = smov %s445_s10 }
  0x4b   : > { %s600_s10 = smov %s449_s11  ;;  %s601_s11 = smov %s507_s17 }
  0x4c   : > { %s602_s12 = smov %s497_s14  ;;  %15 = sbr.rel (!%p13_p8) target bundleno = 3 (0x3), region = 79 }
  0x53   :  { %258 = vsyncpa [#allocation3], 1 }
  0x54   :  { %260 = vsyncpa [#allocation3 + $0x1], 1 }

</bundles_post_ra>
